<compile_context>
chip_gen: v7x
topology: tpu7x:2x2x1
jax: 0.10.0
libtpu: 0.0.40
codegen_flags: <defaults>
</compile_context>

<pallas_src>
import jax
import jax.numpy as jnp
from jax.experimental import pallas as pl
from jax.experimental.pallas import tpu as pltpu

_LANE = 128


# ----------------------------- Pallas kernel --------------------------------

def _make_conv1x1_kernel(c_in: int, c_out: int):
    """1x1-conv (channel mixing) over a (1, C, S_tile, 128) tile.

    x_ref: (1, c_in,  S_tile, 128) VMEM tile
    w_ref: (c_out*c_in,)           SMEM f32 weights (flat, row-major [o, c])
    b_ref: (c_out,)                SMEM f32 bias
    o_ref: (1, c_out, S_tile, 128) VMEM tile

    Channel depth is tiny (4), so the contraction is unrolled VPU multiply-adds
    on dense (S_tile, 128) slabs with SMEM-scalar weights.
    NOTE: if c_in*c_out ever grows past ~32x32, switch this to
    jnp.dot((c_out,c_in), (c_in, chunk), preferred_element_type=f32) on the MXU.
    """

    def kernel(x_ref, w_ref, b_ref, o_ref):
        # Load + cast each input channel slab exactly once (dense vregs).
        xs = [x_ref[0, c].astype(jnp.float32) for c in range(c_in)]
        # Hoist all SMEM scalar reads above the unrolled compute loops.
        wv = [[w_ref[o * c_in + c] for c in range(c_in)] for o in range(c_out)]
        bv = [b_ref[o] for o in range(c_out)]
        for o in range(c_out):                       # static unroll over outputs
            acc = xs[0] * wv[o][0]
            for c in range(1, c_in):
                acc = acc + xs[c] * wv[o][c]
            # Dense (S_tile, 128) store: unmasked, lane-dense vst.
            o_ref[0, o] = (acc + bv[o]).astype(o_ref.dtype)

    return kernel


def _pick_s_tile(s_rows: int, c_in: int, c_out: int, itemsize: int,
                 vmem_budget_bytes: int, n_batch: int) -> int:
    """Rows-of-128 per tile.  Exact VMEM accounting for the (S_tile,128) layout:
    double-buffered in+out tiles use 2*(c_in+c_out)*S_tile*128*itemsize bytes
    (no hidden sublane padding since the minor dims are already (8k, 128))."""
    denom = 2 * (c_in + c_out) * _LANE * itemsize
    cap = max(8, (vmem_budget_bytes // denom) // 8 * 8)   # multiple of 8 sublanes
    s_tile = s_rows if s_rows <= cap else cap
    # Keep enough grid steps so both TensorCores (v7x) get work when it matters.
    while s_tile > 8 and s_tile % 8 == 0 and n_batch * pl.cdiv(s_rows, s_tile) < 4:
        s_tile = max(8, ((s_tile // 2) + 7) // 8 * 8)
    return s_tile


def conv1x1_nchw(x_nchw, w, b, *, vmem_budget_bytes=16 * 1024 * 1024,
                 donate_input=False):
    """y[n,o,h,w] = sum_c W[o,c] * x[n,c,h,w] + b[o], as one Pallas kernel."""
    n, c_in, h, wsp = x_nchw.shape
    c_out = w.shape[0]
    cols = h * wsp

    # Lane-dense view (N, C, S, 128): pure reshape, no transpose.
    if cols % _LANE != 0:
        # Fallback for ragged H*W: pad the flattened spatial dim (extra HBM pass).
        pad = _LANE - cols % _LANE
        x3d = jnp.pad(x_nchw.reshape(n, c_in, cols), ((0, 0), (0, 0), (0, pad)))
        cols_p = cols + pad
    else:
        x3d = x_nchw.reshape(n, c_in, cols)
        cols_p = cols
    s_rows = cols_p // _LANE
    x4d = x3d.reshape(n, c_in, s_rows, _LANE)

    itemsize = jnp.dtype(x_nchw.dtype).itemsize
    s_tile = _pick_s_tile(s_rows, c_in, c_out, itemsize, vmem_budget_bytes, n)
    grid = (n, pl.cdiv(s_rows, s_tile))

    tile_bytes = 2 * (c_in + c_out) * s_tile * _LANE * itemsize   # double-buffered
    vmem_limit = int(min(64 << 20, max(vmem_budget_bytes, tile_bytes) + (4 << 20)))

    # Aliasing is an allocation win only (traffic is still 1 read + 1 write) and
    # without confirmed donation XLA would insert a defensive copy -> off by default.
    aliases = {0: 0} if (donate_input and c_in == c_out) else {}

    cost = pl.CostEstimate(
        flops=2 * n * c_out * c_in * cols,
        transcendentals=0,
        bytes_accessed=(n * c_in * cols_p + n * c_out * cols_p) * itemsize
                       + (c_out * c_in + c_out) * 4,
    )

    out4d = pl.pallas_call(
        _make_conv1x1_kernel(c_in, c_out),
        out_shape=jax.ShapeDtypeStruct((n, c_out, s_rows, _LANE), x_nchw.dtype),
        grid_spec=pltpu.PrefetchScalarGridSpec(
            num_scalar_prefetch=0,
            grid=grid,
            in_specs=[
                pl.BlockSpec((1, c_in, s_tile, _LANE), lambda i, j: (i, 0, j, 0)),
                pl.BlockSpec(memory_space=pltpu.SMEM),   # flat weights, f32
                pl.BlockSpec(memory_space=pltpu.SMEM),   # bias, f32
            ],
            out_specs=pl.BlockSpec((1, c_out, s_tile, _LANE),
                                   lambda i, j: (i, 0, j, 0)),
        ),
        compiler_params=pltpu.CompilerParams(
            dimension_semantics=("parallel", "parallel"),
            vmem_limit_bytes=vmem_limit,
        ),
        cost_estimate=cost,
        input_output_aliases=aliases,
    )(x4d, w.reshape(-1).astype(jnp.float32), b.astype(jnp.float32))

    out3d = out4d.reshape(n, c_out, cols_p)
    if cols_p != cols:
        out3d = out3d[:, :, :cols]
    return out3d.reshape(n, c_out, h, wsp)


# -------------------- Synthetic wrapped model (dict outputs) ----------------

class Conv1x1Model:
    """Stand-in for the nn.Module wrapped by PickModelOutput: a deterministic
    1x1 conv over channels whose forward runs the Pallas kernel and returns a
    dict of named outputs."""

    def __init__(self, in_channels: int, out_channels: int, seed: int = 42):
        k = jax.random.PRNGKey(seed)
        self.w = jax.random.normal(k, (out_channels, in_channels), jnp.float32) * 0.1
        self.b = jnp.linspace(-0.5, 0.5, out_channels, dtype=jnp.float32)

    def __call__(self, x_nchw, **kwargs):
        logits = conv1x1_nchw(x_nchw, self.w, self.b, **kwargs)
        return {"logits": logits, "identity": x_nchw}

    def reference(self, x_nchw):
        y = jnp.einsum("oc,nchw->nohw", self.w, x_nchw) + self.b[None, :, None, None]
        return {"logits": y, "identity": x_nchw}


# --------------------------- PickModelOutput wrapper ------------------------

class PickModelOutput:
    """JAX port of pytorch_toolbelt PickModelOutput: run the wrapped model and
    return output[target_key].  The dict indexing has no compute; all Pallas
    work lives in the wrapped model's forward."""

    def __init__(self, model, key: str):
        self.model = model
        self.target_key = key

    def __call__(self, *inputs, **kwargs):
        output = self.model(*inputs, **kwargs)
        return output[self.target_key]


# ---------------------------------- main ------------------------------------

if __name__ == "__main__":
    key = jax.random.PRNGKey(0)
    N, C, H, W = 2, 4, 16, 16
    x = jax.random.normal(key, (N, C, H, W), dtype=jnp.float32)

    inner = Conv1x1Model(in_channels=C, out_channels=C)
    picker = PickModelOutput(inner, key="logits")

    out = jax.block_until_ready(picker(x))
    ref = inner.reference(x)["logits"]
    assert out.shape == (N, C, H, W)
    assert jnp.allclose(out, ref, atol=1e-5, rtol=1e-5), "mismatch vs reference"

    # Ragged grid along the sublane-row axis: S=10 rows of 128, S_tile forced to 8
    # by a tiny VMEM budget -> last block is partial (Pallas masks its writeback).
    x2 = jax.random.normal(jax.random.PRNGKey(1), (1, 4, 40, 32), dtype=jnp.float32)
    out2 = jax.block_until_ready(picker(x2, vmem_budget_bytes=64 * 1024))
    ref2 = inner.reference(x2)["logits"]
    assert jnp.allclose(out2, ref2, atol=1e-5, rtol=1e-5), "mismatch (ragged S grid)"

    # Non-multiple-of-128 H*W exercises the padded fallback path.
    x3 = jax.random.normal(jax.random.PRNGKey(2), (2, 4, 63, 33), dtype=jnp.float32)
    out3 = jax.block_until_ready(picker(x3))
    ref3 = inner.reference(x3)["logits"]
    assert jnp.allclose(out3, ref3, atol=1e-5, rtol=1e-5), "mismatch (padded path)"

    print("KERNEL_OK")
</pallas_src>

<mosaic_0001>
module attributes {stable_mosaic.version = 11 : i64} {
  func.func @kernel(%arg0: i32, %arg1: i32, %arg2: memref<1x4x2x128xf32, #tpu.memory_space<vmem>>, %arg3: memref<16xf32, #tpu.memory_space<smem>>, %arg4: memref<4xf32, #tpu.memory_space<smem>>, %arg5: memref<1x4x2x128xf32, #tpu.memory_space<vmem>>) attributes {dimension_semantics = [#tpu.dimension_semantics<parallel>, #tpu.dimension_semantics<parallel>], iteration_bounds = array<i64: 2, 1>, scalar_prefetch = 0 : i64, scratch_operands = 0 : i64, tpu.core_type = #tpu.core_type<tc>, window_params = [{transform_indices = @transform_0, window_bounds = array<i64: 1, 4, 2, 128>}, {transform_indices = @transform_1, window_bounds = array<i64: 16>}, {transform_indices = @transform_2, window_bounds = array<i64: 4>}, {transform_indices = @transform_3, window_bounds = array<i64: 1, 4, 2, 128>}]} {
    %c0 = arith.constant 0 : index
    %c0_0 = arith.constant 0 : index
    %c0_1 = arith.constant 0 : index
    %c0_2 = arith.constant 0 : index
    %0 = vector.load %arg2[%c0, %c0_0, %c0_1, %c0_2] : memref<1x4x2x128xf32, #tpu.memory_space<vmem>>, vector<1x1x2x128xf32>
    %1 = vector.shape_cast %0 : vector<1x1x2x128xf32> to vector<2x128xf32>
    %c0_3 = arith.constant 0 : index
    %c1 = arith.constant 1 : index
    %c0_4 = arith.constant 0 : index
    %c0_5 = arith.constant 0 : index
    %2 = vector.load %arg2[%c0_3, %c1, %c0_4, %c0_5] : memref<1x4x2x128xf32, #tpu.memory_space<vmem>>, vector<1x1x2x128xf32>
    %3 = vector.shape_cast %2 : vector<1x1x2x128xf32> to vector<2x128xf32>
    %c0_6 = arith.constant 0 : index
    %c2 = arith.constant 2 : index
    %c0_7 = arith.constant 0 : index
    %c0_8 = arith.constant 0 : index
    %4 = vector.load %arg2[%c0_6, %c2, %c0_7, %c0_8] : memref<1x4x2x128xf32, #tpu.memory_space<vmem>>, vector<1x1x2x128xf32>
    %5 = vector.shape_cast %4 : vector<1x1x2x128xf32> to vector<2x128xf32>
    %c0_9 = arith.constant 0 : index
    %c3 = arith.constant 3 : index
    %c0_10 = arith.constant 0 : index
    %c0_11 = arith.constant 0 : index
    %6 = vector.load %arg2[%c0_9, %c3, %c0_10, %c0_11] : memref<1x4x2x128xf32, #tpu.memory_space<vmem>>, vector<1x1x2x128xf32>
    %7 = vector.shape_cast %6 : vector<1x1x2x128xf32> to vector<2x128xf32>
    %c0_12 = arith.constant 0 : index
    %8 = memref.load %arg3[%c0_12] : memref<16xf32, #tpu.memory_space<smem>>
    %c1_13 = arith.constant 1 : index
    %9 = memref.load %arg3[%c1_13] : memref<16xf32, #tpu.memory_space<smem>>
    %c2_14 = arith.constant 2 : index
    %10 = memref.load %arg3[%c2_14] : memref<16xf32, #tpu.memory_space<smem>>
    %c3_15 = arith.constant 3 : index
    %11 = memref.load %arg3[%c3_15] : memref<16xf32, #tpu.memory_space<smem>>
    %c4 = arith.constant 4 : index
    %12 = memref.load %arg3[%c4] : memref<16xf32, #tpu.memory_space<smem>>
    %c5 = arith.constant 5 : index
    %13 = memref.load %arg3[%c5] : memref<16xf32, #tpu.memory_space<smem>>
    %c6 = arith.constant 6 : index
    %14 = memref.load %arg3[%c6] : memref<16xf32, #tpu.memory_space<smem>>
    %c7 = arith.constant 7 : index
    %15 = memref.load %arg3[%c7] : memref<16xf32, #tpu.memory_space<smem>>
    %c8 = arith.constant 8 : index
    %16 = memref.load %arg3[%c8] : memref<16xf32, #tpu.memory_space<smem>>
    %c9 = arith.constant 9 : index
    %17 = memref.load %arg3[%c9] : memref<16xf32, #tpu.memory_space<smem>>
    %c10 = arith.constant 10 : index
    %18 = memref.load %arg3[%c10] : memref<16xf32, #tpu.memory_space<smem>>
    %c11 = arith.constant 11 : index
    %19 = memref.load %arg3[%c11] : memref<16xf32, #tpu.memory_space<smem>>
    %c12 = arith.constant 12 : index
    %20 = memref.load %arg3[%c12] : memref<16xf32, #tpu.memory_space<smem>>
    %c13 = arith.constant 13 : index
    %21 = memref.load %arg3[%c13] : memref<16xf32, #tpu.memory_space<smem>>
    %c14 = arith.constant 14 : index
    %22 = memref.load %arg3[%c14] : memref<16xf32, #tpu.memory_space<smem>>
    %c15 = arith.constant 15 : index
    %23 = memref.load %arg3[%c15] : memref<16xf32, #tpu.memory_space<smem>>
    %c0_16 = arith.constant 0 : index
    %24 = memref.load %arg4[%c0_16] : memref<4xf32, #tpu.memory_space<smem>>
    %c1_17 = arith.constant 1 : index
    %25 = memref.load %arg4[%c1_17] : memref<4xf32, #tpu.memory_space<smem>>
    %c2_18 = arith.constant 2 : index
    %26 = memref.load %arg4[%c2_18] : memref<4xf32, #tpu.memory_space<smem>>
    %c3_19 = arith.constant 3 : index
    %27 = memref.load %arg4[%c3_19] : memref<4xf32, #tpu.memory_space<smem>>
    %28 = vector.broadcast %8 : f32 to vector<2x128xf32>
    %29 = arith.mulf %1, %28 : vector<2x128xf32>
    %30 = vector.broadcast %9 : f32 to vector<2x128xf32>
    %31 = arith.mulf %3, %30 : vector<2x128xf32>
    %32 = arith.addf %29, %31 : vector<2x128xf32>
    %33 = vector.broadcast %10 : f32 to vector<2x128xf32>
    %34 = arith.mulf %5, %33 : vector<2x128xf32>
    %35 = arith.addf %32, %34 : vector<2x128xf32>
    %36 = vector.broadcast %11 : f32 to vector<2x128xf32>
    %37 = arith.mulf %7, %36 : vector<2x128xf32>
    %38 = arith.addf %35, %37 : vector<2x128xf32>
    %39 = vector.broadcast %24 : f32 to vector<2x128xf32>
    %40 = arith.addf %38, %39 : vector<2x128xf32>
    %c0_20 = arith.constant 0 : index
    %c0_21 = arith.constant 0 : index
    %c0_22 = arith.constant 0 : index
    %c0_23 = arith.constant 0 : index
    %41 = vector.load %arg5[%c0_20, %c0_21, %c0_22, %c0_23] : memref<1x4x2x128xf32, #tpu.memory_space<vmem>>, vector<1x1x2x128xf32>
    %42 = vector.shape_cast %41 : vector<1x1x2x128xf32> to vector<2x128xf32>
    %43 = vector.shape_cast %40 : vector<2x128xf32> to vector<1x1x2x128xf32>
    tpu.vector_store %arg5[%c0_20, %c0_21, %c0_22, %c0_23], %43 {strides = array<i32>} : memref<1x4x2x128xf32, #tpu.memory_space<vmem>>, vector<1x1x2x128xf32>,
    %44 = vector.broadcast %12 : f32 to vector<2x128xf32>
    %45 = arith.mulf %1, %44 : vector<2x128xf32>
    %46 = vector.broadcast %13 : f32 to vector<2x128xf32>
    %47 = arith.mulf %3, %46 : vector<2x128xf32>
    %48 = arith.addf %45, %47 : vector<2x128xf32>
    %49 = vector.broadcast %14 : f32 to vector<2x128xf32>
    %50 = arith.mulf %5, %49 : vector<2x128xf32>
    %51 = arith.addf %48, %50 : vector<2x128xf32>
    %52 = vector.broadcast %15 : f32 to vector<2x128xf32>
    %53 = arith.mulf %7, %52 : vector<2x128xf32>
    %54 = arith.addf %51, %53 : vector<2x128xf32>
    %55 = vector.broadcast %25 : f32 to vector<2x128xf32>
    %56 = arith.addf %54, %55 : vector<2x128xf32>
    %c0_24 = arith.constant 0 : index
    %c1_25 = arith.constant 1 : index
    %c0_26 = arith.constant 0 : index
    %c0_27 = arith.constant 0 : index
    %57 = vector.load %arg5[%c0_24, %c1_25, %c0_26, %c0_27] : memref<1x4x2x128xf32, #tpu.memory_space<vmem>>, vector<1x1x2x128xf32>
    %58 = vector.shape_cast %57 : vector<1x1x2x128xf32> to vector<2x128xf32>
    %59 = vector.shape_cast %56 : vector<2x128xf32> to vector<1x1x2x128xf32>
    tpu.vector_store %arg5[%c0_24, %c1_25, %c0_26, %c0_27], %59 {strides = array<i32>} : memref<1x4x2x128xf32, #tpu.memory_space<vmem>>, vector<1x1x2x128xf32>,
    %60 = vector.broadcast %16 : f32 to vector<2x128xf32>
    %61 = arith.mulf %1, %60 : vector<2x128xf32>
    %62 = vector.broadcast %17 : f32 to vector<2x128xf32>
    %63 = arith.mulf %3, %62 : vector<2x128xf32>
    %64 = arith.addf %61, %63 : vector<2x128xf32>
    %65 = vector.broadcast %18 : f32 to vector<2x128xf32>
    %66 = arith.mulf %5, %65 : vector<2x128xf32>
    %67 = arith.addf %64, %66 : vector<2x128xf32>
    %68 = vector.broadcast %19 : f32 to vector<2x128xf32>
    %69 = arith.mulf %7, %68 : vector<2x128xf32>
    %70 = arith.addf %67, %69 : vector<2x128xf32>
    %71 = vector.broadcast %26 : f32 to vector<2x128xf32>
    %72 = arith.addf %70, %71 : vector<2x128xf32>
    %c0_28 = arith.constant 0 : index
    %c2_29 = arith.constant 2 : index
    %c0_30 = arith.constant 0 : index
    %c0_31 = arith.constant 0 : index
    %73 = vector.load %arg5[%c0_28, %c2_29, %c0_30, %c0_31] : memref<1x4x2x128xf32, #tpu.memory_space<vmem>>, vector<1x1x2x128xf32>
    %74 = vector.shape_cast %73 : vector<1x1x2x128xf32> to vector<2x128xf32>
    %75 = vector.shape_cast %72 : vector<2x128xf32> to vector<1x1x2x128xf32>
    tpu.vector_store %arg5[%c0_28, %c2_29, %c0_30, %c0_31], %75 {strides = array<i32>} : memref<1x4x2x128xf32, #tpu.memory_space<vmem>>, vector<1x1x2x128xf32>,
    %76 = vector.broadcast %20 : f32 to vector<2x128xf32>
    %77 = arith.mulf %1, %76 : vector<2x128xf32>
    %78 = vector.broadcast %21 : f32 to vector<2x128xf32>
    %79 = arith.mulf %3, %78 : vector<2x128xf32>
    %80 = arith.addf %77, %79 : vector<2x128xf32>
    %81 = vector.broadcast %22 : f32 to vector<2x128xf32>
    %82 = arith.mulf %5, %81 : vector<2x128xf32>
    %83 = arith.addf %80, %82 : vector<2x128xf32>
    %84 = vector.broadcast %23 : f32 to vector<2x128xf32>
    %85 = arith.mulf %7, %84 : vector<2x128xf32>
    %86 = arith.addf %83, %85 : vector<2x128xf32>
    %87 = vector.broadcast %27 : f32 to vector<2x128xf32>
    %88 = arith.addf %86, %87 : vector<2x128xf32>
    %c0_32 = arith.constant 0 : index
    %c3_33 = arith.constant 3 : index
    %c0_34 = arith.constant 0 : index
    %c0_35 = arith.constant 0 : index
    %89 = vector.load %arg5[%c0_32, %c3_33, %c0_34, %c0_35] : memref<1x4x2x128xf32, #tpu.memory_space<vmem>>, vector<1x1x2x128xf32>
    %90 = vector.shape_cast %89 : vector<1x1x2x128xf32> to vector<2x128xf32>
    %91 = vector.shape_cast %88 : vector<2x128xf32> to vector<1x1x2x128xf32>
    tpu.vector_store %arg5[%c0_32, %c3_33, %c0_34, %c0_35], %91 {strides = array<i32>} : memref<1x4x2x128xf32, #tpu.memory_space<vmem>>, vector<1x1x2x128xf32>,
    return
  }
  func.func @transform_0(%arg0: i32, %arg1: i32) -> (i32, i32, i32, i32) {
    %c0_i32 = arith.constant 0 : i32
    %c0_i32_0 = arith.constant 0 : i32
    %c0_i32_1 = arith.constant 0 : i32
    return %arg0, %c0_i32, %arg1, %c0_i32_0 : i32, i32, i32, i32
  }
  func.func @transform_1(%arg0: i32, %arg1: i32) -> i32 {
    %c0_i32 = arith.constant 0 : i32
    %c0_i32_0 = arith.constant 0 : i32
    return %c0_i32 : i32
  }
  func.func @transform_2(%arg0: i32, %arg1: i32) -> i32 {
    %c0_i32 = arith.constant 0 : i32
    %c0_i32_0 = arith.constant 0 : i32
    return %c0_i32 : i32
  }
  func.func @transform_3(%arg0: i32, %arg1: i32) -> (i32, i32, i32, i32) {
    %c0_i32 = arith.constant 0 : i32
    %c0_i32_0 = arith.constant 0 : i32
    %c0_i32_1 = arith.constant 0 : i32
    return %arg0, %c0_i32, %arg1, %c0_i32_0 : i32, i32, i32, i32
  }
}

</mosaic_0001>

<bundles_post_ra>
// kernel: tpu_custom_call.1
= control target key start
LH: loop header
LB: loop body
LE: loop exit
PB: predicated region body
PF: predicated region fallthrough
CT: control target
= control target key end

     0   :  { %8 = vsyncpa [#allocation3], 0  ;;  %s1005_s0 = inlined_call_operand.hbm [shape: f32[2,4,2,128], index: 0, kind: input, shape index: {}]   ;;  %s1006_s1 = inlined_call_operand.vmem [shape: f32[16], index: 1, kind: input, shape index: {}]   ;;  %s1007_s2 = inlined_call_operand.vmem [shape: f32[4], index: 2, kind: input, shape index: {}]   ;;  %s1008_s3 = inlined_call_operand.hbm [shape: f32[2,4,2,128], index: 3, kind: output, shape index: {}]  }
   0x1   :  { %10 = vsyncpa [#allocation3 + $0x1], 0 }
   0x2   :  { %11 = vsyncpa [#allocation5], 0 }
   0x3   :  { %12 = vsyncpa [#allocation8], 0 }
   0x4   :  { %13 = vsyncpa [#allocation4], 0 }
   0x5   :  { %15 = vsyncpa [#allocation4 + $0x1], 0  ;;  %s753_s12 = smov 0   ;;  %s755_s13 = smov 0  }
   0x6   :  { %s757_s14 = smov 0   ;;  %s759_s15 = smov 0  }
   0x7   :  { %s761_s16 = smov 0   ;;  %s763_s17 = smov 0  }
   0x8 LB: > { %s441_s18 = sadd.s32 4294967295, %s723_s17   ;;  %s442_s19 = sadd.s32 4294967294, %s723_s17   ;;  %s723_s17 = sphi %s763_s17, %s21_s17   ;;  %s719_s16 = sphi %s761_s16, %s1036_s16   ;;  %s715_s15 = sphi %s759_s15, %s1035_s15   ;;  %s711_s14 = sphi %s757_s14, %s1034_s14   ;;  %s707_s13 = sphi %s755_s13, %s1033_s13   ;;  %s703_s12 = sphi %s753_s12, %s1032_s12  }
   0x9   : > { %s42_s20 = sadd.s32 1, %s711_s14  ;;  %p49_p0 = scmp.ne.s32.totalorder %s711_s14, %s707_s13 }
   0xa   : > { %p50_p1 = scmp.eq.s32.totalorder %s723_s17, 0  ;;  %p55_p2 = scmp.ne.s32.totalorder %s707_s13, %s703_s12 }
   0xb   : > { %p791_p3 = scmp.eq.s32.totalorder %s441_s18, 0  ;;  %p123_p4 = scmp.eq.s32.totalorder %s441_s18, 1 }
   0xc   : > { %p795_p5 = por %p50_p1, %p49_p0  ;;  %p129_p6 = scmp.eq.s32.totalorder %s442_s19, 1 }
   0xd   : > { %s1016_s21 = scalar_select %p791_p3, 1, 0 }
   0xe   : > { %p801_p7 = por %p791_p3, %p55_p2  ;;  %p805_p8 = por %p123_p4, %p49_p0 }
   0xf   : > { %p809_p9 = por %p129_p6, %p55_p2  ;;  %p443_p10 = scmp.ge.s32.totalorder %s723_s17, 1 }
  0x10   : > { %s1018_s23 = scalar_select %p801_p7, 1, 0 }
  0x11   : > { %s1019_s24 = scalar_select %p805_p8, 1, 0 }
  0x12   : > { %s1020_s25 = scalar_select %p809_p9, 1, 0 }
  0x13   : > { %p136_p11 = scmp.lt.s32.totalorder %s723_s17, 3  ;;  %s149_s28 = sshll.u32 %s1006_s1, 4  ;;  %s150_s28 = int_to_ptr.vmem [resolvable:$true] %s149_s28 }
  0x14   : > { %p515_p0 = scmp.lt.s32.totalorder %s723_s17, 2  ;;  %s160_s5 = sshll.u32 %s1007_s2, 4  ;;  %s161_s5 = int_to_ptr.vmem [resolvable:$true] %s160_s5 }
  0x15   : > { %p818_p12 = pnand %p443_p10, %p136_p11  ;;  %s573_s8 = scalar_lea.vmem %s150_s28, 16 }
  0x16   : > { %p831_p2 = pnand %p515_p0, %p795_p5  ;;  %p574_p6 = scmp.ne.s32.totalorder %s150_s28, %s573_s8 }
  0x17   : > { %s1021_s29 = scalar_select %p818_p12, 1, 0 }
  0x18   : > { %p498_p1 = pneg %p818_p12  ;;  %p581_p9 = scmp.lt.s32.totalorder %s150_s28, %s150_s28 }
  0x19   : > { %s1022_s6 = scalar_select %p831_p2, 1, 0 }
  0x1a   : > { %p837_p4 = pnand %p498_p1, %p791_p3  ;;  %p582_p8 = scmp.lt.s32.totalorder %s573_s8, %s573_s8 }
  0x1c   : > { %p575_p10 = pneg %p837_p4  ;;  %p583_p7 = por %p582_p8, %p581_p9 }
  0x1e   : > { %p576_p11 = pnand %p575_p10, %p574_p6 }
  0x20   : > { %p577_p13 = pneg %p576_p11 }
  0x22   : > { %p584_p5 = pnand %p583_p7, %p577_p13 }
  0x24   : > { %587 = shalt.err (!%p584_p5)
}
  0x25   : > { %s725_s9 = smov [#allocation6]   ;;  %s588_s10 = scalar_lea.vmem %s161_s5, 16 }
  0x26   : > { %501 = dma.vmem_to_smem (!%p837_p4), %s150_s28, 16, %s725_s9, [#allocation5]  }
  0x27   : > { %p589_p0 = scmp.ne.s32.totalorder %s161_s5, %s588_s10  ;;  %p596_p12 = scmp.lt.s32.totalorder %s161_s5, %s161_s5 }
  0x28   : > { %p597_p2 = scmp.lt.s32.totalorder %s588_s10, %s588_s10 }
  0x29   : > { %p591_p1 = pnand %p589_p0, %p575_p10 }
  0x2a   : > { %p598_p6 = por %p597_p2, %p596_p12 }
  0x2b   : > { %p592_p3 = pneg %p591_p1 }
  0x2d   : > { %p599_p11 = pnand %p598_p6, %p592_p3 }
  0x2f   : > { %602 = shalt.err (!%p599_p11)
}
  0x30   : > { %s726_s11 = smov [#allocation7]   ;;  %s33_s18 = sadd.s32 1, %s719_s16 }
  0x31   : > { %504 = dma.vmem_to_smem (!%p837_p4), %s161_s5, 16, %s726_s11, [#allocation8]  }
  0x32   : > { %s171_s19 = sand.u32 1, %s711_s14   ;;  %p35_p7 = scmp.ge.s32.totalorder %s33_s18, 2 }
  0x33   : > { %s447_s22 = sshll.u32 %s171_s19, 3  ;;  %s484_s26 = sshll.u32 %s719_s16, 7 }
  0x34   : > { %s1038_s18 = smov (%p35_p7, %s33_s18), 0  ;;  %s855_s30 = scalar_lea.hbm %s1005_s0, %s484_s26 }
  0x35   : > { %s37_s4 = ssub.s32 %s719_s16, %s1038_s18  ;;  %s175_s5 = scalar_lea.vmem [#allocation2], %s447_s22 }
  0x36   : > { %s183_s7 = sshll.u32 %s175_s5, 4  ;;  %p40_p3 = scmp.eq.s32.totalorder %s37_s4, 0  ;;  %s859_s7 = int_to_ptr.vmem [resolvable:$true] %s183_s7 }
  0x37   : > { %s866_s9 = scalar_lea.sflag [#allocation3], %s171_s19  ;;  %s603_s10 = scalar_lea.hbm %s855_s30, 128 }
  0x38   : > { %s864_s8 = scalar_select %p40_p3, %s711_s14, %s42_s20  }
  0x39   : > { %p604_p8 = scmp.ne.s32.totalorder %s855_s30, %s603_s10  ;;  %p1024_p9 = scmp.ne.s32.totalorder %s1022_s6, 0 }
  0x3a   : > { %s608_s22 = scalar_lea.hbm %s1005_s0, 256  ;;  %p609_p4 = scmp.lt.u32.totalorder %s855_s30, %s1005_s0 }
  0x3b   : > { %p605_p12 = pneg %p1024_p9  ;;  %p610_p10 = scmp.lt.u32.totalorder %s608_s22, %s603_s10 }
  0x3c   : > { %p612_p0 = scmp.lt.u32.totalorder %s603_s10, %s855_s30 }
  0x3d   : > { %p606_p13 = pnand %p605_p12, %p604_p8  ;;  %p611_p5 = por %p610_p10, %p609_p4 }
  0x3f   : > { %p607_p2 = pneg %p606_p13  ;;  %p613_p1 = por %p612_p0, %p611_p5 }
  0x41   : > { %p614_p6 = pnand %p613_p1, %p607_p2 }
  0x43   : > { %617 = shalt.err (!%p614_p6)
}
  0x44   : > { %s618_s20 = scalar_lea.vmem %s859_s7, 128  ;;  %s727_s19 = smov [#allocation2]  }
  0x45   : > { %p619_p11 = scmp.ne.s32.totalorder %s859_s7, %s618_s20  ;;  %s623_s4 = sshll.u32 %s727_s19, 4  ;;  %s624_s4 = int_to_ptr.vmem [resolvable:$false] %s623_s4 }
  0x46   : > { %s625_s5 = scalar_lea.vmem %s624_s4, 256  ;;  %p626_p8 = scmp.lt.s32.totalorder %s859_s7, %s624_s4 }
  0x47   : > { %p621_p7 = pnand %p619_p11, %p605_p12  ;;  %p627_p13 = scmp.lt.s32.totalorder %s625_s5, %s618_s20 }
  0x49   : > { %p622_p3 = pneg %p621_p7  ;;  %p628_p4 = por %p627_p13, %p626_p8 }
  0x4b   : > { %p629_p10 = pnand %p628_p4, %p622_p3 }
  0x4d   : > { %632 = shalt.err (!%p629_p10)
}
  0x4e   : > { %s728_s10 = smov 32   ;;  %s729_s11 = smov 2  }
  0x4f   : > { %508 = dma.hbm_to_vmem [thread:$0]  (!%p1024_p9), %s855_s30, 128, %s859_s7, %s866_s9, %s728_s10, %s728_s10, %s729_s11  }
  0x50   : > { %p1025_p12 = scmp.ne.s32.totalorder %s1021_s29, 0 }
  0x51   : > { %s897_s26 = sand.u32 (!%p1025_p12), 1, %s707_s13   ;;  %p1026_p2 = scmp.ne.s32.totalorder (!%p1025_p12), %s1018_s23, 0 }
  0x52   : > { %195 = sbr.rel (%p1025_p12) target bundleno = 138 (0x8a), region = 32  ;;  %s1015_s22 = sshll.u32 (!%p1025_p12), %s897_s26, 3 }
  0x53   : > { %s198_s27 = scalar_lea.sflag (!%p1025_p12), [#allocation3], %s897_s26  ;;  %s201_s28 = scalar_lea.vmem (!%p1025_p12), [#allocation2], %s1015_s22 }
  0x59   : > { %686 = dma.done.wait (%p1026_p2), %s198_s27, 128  }
  0x5a   : > { %688 = vsyncadd (%p1026_p2), %s198_s27, 4294967168  ;;  %p1027_p9 = scmp.ne.s32.totalorder %s1016_s21, 0 }
  0x5c   : > { %690 = dma.done.wait (%p1027_p9), [#allocation5], 16  }
  0x5d   : > { %692 = vsyncadd (%p1027_p9), [#allocation5], 4294967280 }
  0x5e   : > { %694 = dma.done.wait (%p1027_p9), [#allocation8], 16  }
  0x5f   : > { %696 = vsyncadd (%p1027_p9), [#allocation8], 4294967280 }
  0x60   : > { %214 = sfence }
  0x61   : > { %s240_s29 = sld [smem:[#allocation6]]  ;;  %s458_s6 = sld [smem:[#allocation6 + $0x1]]  ;;  %v233_v0 = vld [vmem:[%s201_s28] sm:$0x3]  ;;  %v455_v1 = vld [vmem:[%s201_s28 + $0x2] sm:$0x3] }
  0x62   : > { %s459_s30 = sld [smem:[#allocation6 + $0x2]]  ;;  %s460_s7 = sld [smem:[#allocation6 + $0x3]]  ;;  %v456_v2 = vld [vmem:[%s201_s28 + $0x4] sm:$0x3]  ;;  %v457_v4 = vld [vmem:[%s201_s28 + $0x6] sm:$0x3] }
  0x63   : > { %s461_s23 = sld [smem:[#allocation6 + $0x4]]  ;;  %s915_s9 = sld [smem:[#allocation7]] }
  0x64   : > { %s462_s20 = sld [smem:[#allocation6 + $0x5]]  ;;  %s917_s19 = sld [smem:[#allocation6 + $0x6]] }
  0x65   : > { %s464_s4 = sld [smem:[#allocation6 + $0x7]]  ;;  %s919_s5 = sld [smem:[#allocation7 + $0x1]] }
  0x66   : > { %s921_s21 = sld [smem:[#allocation6 + $0x8]]  ;;  %s466_s10 = sld [smem:[#allocation6 + $0x9]] }
  0x67   : > { %v260_v3 = vstv %s240_s29  ;;  %v262_v6 = vstv %s458_s6  ;;  %s467_s11 = sld [smem:[#allocation6 + $0xa]]  ;;  %s923_s27 = sld [smem:[#allocation6 + $0xb]] }
  0x68   : > { %v261_v5 = vmul.f32 %v260_v3, %v233_v0  ;;  %v265_v7 = vstv %s459_s30  ;;  %v263_v8 = vmul.f32 %v455_v1, %v262_v6  ;;  %v268_v10 = vstv %s460_s7  ;;  %s925_s22 = sld [smem:[#allocation6 + $0xc]]  ;;  %s927_s29 = sld [smem:[#allocation6 + $0xd]] }
  0x69   : > { %v266_v9 = vmul.f32 %v456_v2, %v265_v7  ;;  %v274_v11 = vstv %s461_s23  ;;  %v269_v13 = vmul.f32 %v457_v4, %v268_v10  ;;  %s929_s28 = sld [smem:[#allocation6 + $0xe]]  ;;  %s931_s6 = sld [smem:[#allocation6 + $0xf]]  ;;  %v271_v20 = vstv %s915_s9 }
  0x6a   : > { %v264_v12 = vadd.f32 %v263_v8, %v261_v5  ;;  %v275_v14 = vmul.f32 %v274_v11, %v233_v0  ;;  %v276_v15 = vstv %s462_s20  ;;  %v279_v17 = vstv %s917_s19  ;;  %s934_s30 = sld [smem:[#allocation7 + $0x2]]  ;;  %s940_s7 = sld [smem:[#allocation7 + $0x3]] }
  0x6b   : > { %v277_v16 = vmul.f32 %v455_v1, %v276_v15  ;;  %v282_v18 = vstv %s464_s4  ;;  %v280_v21 = vmul.f32 %v456_v2, %v279_v17  ;;  %v285_v32 = vstv %s919_s5  ;;  %s1028_s23 = sshll.u32 %s897_s26, 3  ;;  %s485_s20 = sshll.u32 %s715_s15, 7 }
  0x6c   : > { %v267_v19 = vadd.f32 %v266_v9, %v264_v12  ;;  %v283_v22 = vmul.f32 %v457_v4, %v282_v18  ;;  %v289_v24 = vstv %s921_s21  ;;  %v291_v25 = vstv %s466_s10  ;;  %s232_s9 = scalar_lea.vmem [#allocation9], %s1028_s23  ;;  %s956_s5 = scalar_lea.hbm %s1008_s3, %s485_s20 }
  0x6d   : > { %v278_v23 = vadd.f32 %v277_v16, %v275_v14  ;;  %v294_v26 = vstv %s467_s11  ;;  %v290_v28 = vmul.f32 %v289_v24, %v233_v0  ;;  %v292_v29 = vmul.f32 %v455_v1, %v291_v25  ;;  %s320_s21 = scalar_lea.sflag [#allocation4], %s897_s26  ;;  %p1029_p0 = scmp.ne.s32.totalorder %s1019_s24, 0 }
  0x6e   : > { %v270_v27 = vadd.f32 %v269_v13, %v267_v19  ;;  %v295_v30 = vmul.f32 %v456_v2, %v294_v26  ;;  %v297_v33 = vstv %s923_s27  ;;  %v304_v34 = vstv %s925_s22  ;;  %s334_s22 = sshll.u32 %s232_s9, 4  ;;  %s730_s15 = smov [#allocation9]   ;;  %s951_s22 = int_to_ptr.vmem [resolvable:$true] %s334_s22 }
  0x6f   : > { %v281_v31 = vadd.f32 %v280_v21, %v278_v23  ;;  %v293_v36 = vadd.f32 %v292_v29, %v290_v28  ;;  %v298_v37 = vmul.f32 %v457_v4, %v297_v33  ;;  %v305_v38 = vmul.f32 %v304_v34, %v233_v0  ;;  %s633_s10 = scalar_lea.vmem %s951_s22, 128  ;;  %s637_s11 = sshll.u32 %s730_s15, 4  ;;  %s638_s11 = int_to_ptr.vmem [resolvable:$false] %s637_s11 }
  0x70   : > { %v272_v35 = vadd.f32 %v271_v20, %v270_v27  ;;  %v306_v40 = vstv %s927_s29  ;;  %v309_v41 = vstv %s929_s28  ;;  %v312_v42 = vstv %s931_s6  ;;  %p634_p5 = scmp.ne.s32.totalorder %s951_s22, %s633_s10  ;;  %s639_s27 = scalar_lea.vmem %s638_s11, 256 }
  0x71   : > { %v284_v39 = vadd.f32 %v283_v22, %v281_v31  ;;  %v296_v43 = vadd.f32 %v295_v30, %v293_v36  ;;  %v307_v44 = vmul.f32 %v455_v1, %v306_v40  ;;  %v310_v45 = vmul.f32 %v456_v2, %v309_v41  ;;  %p640_p11 = scmp.lt.s32.totalorder %s951_s22, %s638_s11  ;;  %p641_p7 = scmp.lt.s32.totalorder %s639_s27, %s633_s10 }
  0x72   : > { %273 = vst [vmem:[%s232_s9] sm:$0x3] %v272_v35  ;;  %v300_v47 = vstv %s934_s30  ;;  %v313_v50 = vmul.f32 %v457_v4, %v312_v42  ;;  %v315_v53 = vstv %s940_s7  ;;  %p635_p1 = pnand %p634_p5, %p1029_p0 }
  0x73   : > { %v286_v46 = vadd.f32 %v285_v32, %v284_v39  ;;  %v299_v48 = vadd.f32 %v298_v37, %v296_v43  ;;  %v308_v49 = vadd.f32 %v307_v44, %v305_v38  ;;  %p642_p3 = por %p641_p7, %p640_p11 }
  0x74   : > { %p636_p6 = pneg %p635_p1 }
  0x75   : > { %476 = vst [vmem:[%s232_s9 + $0x2] sm:$0x3] %v286_v46  ;;  %v301_v51 = vadd.f32 %v300_v47, %v299_v48  ;;  %v311_v52 = vadd.f32 %v310_v45, %v308_v49 }
  0x76   : > { %p643_p8 = pnand %p642_p3, %p636_p6 }
  0x77   : > { %477 = vst [vmem:[%s232_s9 + $0x4] sm:$0x3] %v301_v51  ;;  %v314_v54 = vadd.f32 %v313_v50, %v311_v52 }
  0x79   : > { %v316_v55 = vadd.f32 %v315_v53, %v314_v54 }
  0x7b   : > { %478 = vst [vmem:[%s232_s9 + $0x6] sm:$0x3] %v316_v55 }
  0x7c   : > { %646 = shalt.err (!%p643_p8)
}
  0x7d   : > { %s647_s29 = scalar_lea.hbm %s956_s5, 128  ;;  %s651_s30 = scalar_lea.hbm %s1008_s3, 256 }
  0x7e   : > { %p648_p13 = scmp.ne.s32.totalorder %s956_s5, %s647_s29  ;;  %p652_p12 = scmp.lt.u32.totalorder %s956_s5, %s1008_s3 }
  0x7f   : > { %p653_p2 = scmp.lt.u32.totalorder %s651_s30, %s647_s29  ;;  %p655_p5 = scmp.lt.u32.totalorder %s647_s29, %s956_s5 }
  0x80   : > { %p649_p4 = pnand %p648_p13, %p1029_p0 }
  0x81   : > { %p654_p9 = por %p653_p2, %p652_p12 }
  0x82   : > { %p650_p10 = pneg %p649_p4 }
  0x83   : > { %p656_p1 = por %p655_p5, %p654_p9 }
  0x85   : > { %p657_p6 = pnand %p656_p1, %p650_p10 }
  0x87   : > { %660 = shalt.err (!%p657_p6)
}
  0x88   : > { %s731_s9 = smov 32   ;;  %s732_s20 = smov 2  }
  0x89   : > { %496 = dma.vmem_to_hbm [thread:$0]  (%p1029_p0), %s951_s22, 128, %s956_s5, %s320_s21, %s731_s9, %s731_s9, %s732_s20  }
  0x8a PF: > { %s349_s19 = sand.u32 1, %s703_s12   ;;  %p1030_p11 = scmp.ne.s32.totalorder %s1020_s25, 0 }
  0x8b   : > { %p1031_p7 = scmp.ge.s32.totalorder %s723_s17, 2  ;;  %s350_s4 = scalar_lea.sflag [#allocation4], %s349_s19 }
  0x8d   : > { %p510_p3 = pnand %p1031_p7, %p1030_p11 }
  0x8f   : > { %698 = dma.done.wait (!%p510_p3), %s350_s4, 128  }
  0x90   : > { %700 = vsyncadd (!%p510_p3), %s350_s4, 4294967168  ;;  %s21_s17 = sadd.s32 1, %s723_s17   ;;  %s1032_s12 = smov %s707_s13 }
  0x91   : > { %p18_p8 = scmp.ge.s32.totalorder %s21_s17, 4   ;;  %s1033_s13 = smov %s711_s14 }
  0x92   : > { %s1034_s14 = smov %s864_s8  ;;  %s1035_s15 = smov %s719_s16 }
  0x93   : > { %s1036_s16 = smov %s1038_s18  ;;  %20 = sbr.rel (!%p18_p8) target bundleno = 8 (0x8), region = 92 }
  0x9a   :  { %355 = vsyncpa [#allocation3], 1 }
  0x9b   :  { %357 = vsyncpa [#allocation3 + $0x1], 1 }
  0x9c   :  { %358 = vsyncpa [#allocation4], 1 }
  0x9d   :  { %360 = vsyncpa [#allocation4 + $0x1], 1 }
  0x9e   :  { %361 = vsyncpa [#allocation5], 1 }
  0x9f   :  { %363 = vsyncpa [#allocation5 + $0x1], 1 }
  0xa0   :  { %364 = vsyncpa [#allocation8], 1 }

</bundles_post_ra>
